<compile_context>
chip_gen: v6e
topology: v6e:2x2x1
jax: 0.10.0
libtpu: 0.0.40
codegen_flags: <defaults>
</compile_context>

<pallas_src>
import jax
import jax.numpy as jnp
from jax.experimental import pallas as pl
from jax.experimental.pallas import tpu as pltpu


def _weighted_mean_kernel(w_ref, x_ref, o_ref):
    # w_ref: SMEM (H*S,) f32 weights, pre-scaled by 1/S (scalar reads)
    # x_ref: VMEM (S, TR, C) input tile of hop h (hop dim squeezed away)
    # o_ref: VMEM (TR, C) output tile of hop h
    h = pl.program_id(0)
    s = x_ref.shape[0]
    acc = x_ref[0].astype(jnp.float32) * w_ref[h * s]
    for k in range(1, s):                     # tiny static loop over subgraphs (VPU)
        acc = acc + x_ref[k].astype(jnp.float32) * w_ref[h * s + k]
    o_ref[...] = acc.astype(o_ref.dtype)


def _detect_num_tensorcores():
    """v5e/v6e expose 1 TensorCore per device, v7x exposes 2.  Falls back to 1
    (no tile back-off: optimal for v5e/v6e, at worst a tail imbalance on v7x)."""
    try:
        info = pltpu.get_tpu_info()
        for name in ("num_cores", "num_tensorcores", "tensorcores_per_chip",
                     "cores_per_chip", "core_count"):
            v = getattr(info, name, None)
            if isinstance(v, int) and v > 0:
                return v
    except Exception:
        pass
    try:
        v = getattr(jax.devices()[0], "num_cores", None)
        if isinstance(v, int) and v > 0:
            return v
    except Exception:
        pass
    return 1


def _choose_tile_r(r, c, s, in_itemsize, out_itemsize, *, hops, num_cores,
                   vmem_budget_bytes=16 * 1024 * 1024):
    """Row tile along the (flattened) row axis of the (R, C) feature view."""
    # Double-buffered x block + out block + f32 accumulator / cast temporaries.
    per_row = c * (2 * s * in_itemsize + 2 * out_itemsize + 2 * 4)
    budget_rows = max(8, (vmem_budget_bytes // per_row) // 8 * 8)
    tile_r = min(budget_rows, pl.cdiv(r, 8) * 8)
    if tile_r >= r:
        tile_r = r                       # one full-extent row block (always legal)

    def steps(t):
        return hops * pl.cdiv(r, t)

    # Prefer equal-size blocks: largest multiple of 8 <= tile_r dividing R,
    # unless that would more than halve the tile.
    if tile_r < r and r % 8 == 0 and r % tile_r != 0:
        d = tile_r - (tile_r % 8)
        while d >= 8 and r % d != 0:
            d -= 8
        if d >= 8 and 2 * d >= tile_r:
            tile_r = d

    # v7x megacore: make the total grid-step count a multiple of the TC count
    # so neither core idles on the tail; split along rows, not hops.
    # No-op when num_cores == 1 (v5e/v6e keep the maximal tile).
    if num_cores > 1 and steps(tile_r) % num_cores != 0:
        floor = max(8, tile_r // 4)
        t = min(tile_r, (r - 1) // 8 * 8)     # must be a multiple of 8 and < r
        while t >= floor and t >= 8 and steps(t) % num_cores != 0:
            t -= 8
        if t >= 8 and t >= floor and steps(t) % num_cores == 0:
            tile_r = t
    return tile_r


def one_dim_conv_weight_shared(x, w, *, tile_r=None, num_cores=None):
    """x: (H, S, N, F) stacked feat_list_list, w: (H, S) -> stacked (H, N, F).

    out[i] corresponds to the PyTorch module's aggregated_feat_list[i]."""
    H, S, N, F = x.shape
    assert w.shape == (H, S)
    L = N * F

    # Lane-dense view of each hop/subgraph feature matrix.
    if L % 128 == 0:
        R, C = L // 128, 128
    else:
        # TODO(synk): if L % 128 != 0 AND F is huge, add an F-tiling grid axis;
        # here we fall back to the natural (N, F) view (still correct).
        R, C = N, F

    in_isz = jnp.dtype(x.dtype).itemsize
    out_dtype = x.dtype
    out_isz = jnp.dtype(out_dtype).itemsize
    if num_cores is None:
        num_cores = _detect_num_tensorcores()
    if tile_r is None:
        tile_r = _choose_tile_r(R, C, S, in_isz, out_isz,
                                hops=H, num_cores=num_cores)

    x_view = x.reshape(H, S, R, C)            # free, contiguous (trailing-dim) reshape
    # Fold the 1/S of mean() into the tiny weight table; flatten to 1D so SMEM
    # residency stays cheap (a 2D SMEM array would pad to [8, 128] words).
    w_scaled = (w.astype(jnp.float32) * (1.0 / S)).reshape(H * S)

    out = pl.pallas_call(
        _weighted_mean_kernel,
        out_shape=jax.ShapeDtypeStruct((H, R, C), out_dtype),
        grid_spec=pltpu.PrefetchScalarGridSpec(
            num_scalar_prefetch=0,
            grid=(H, pl.cdiv(R, tile_r)),
            in_specs=[
                pl.BlockSpec(memory_space=pltpu.MemorySpace.SMEM),     # weights
                pl.BlockSpec((None, S, tile_r, C),                     # x tile, hop squeezed
                             lambda h, j: (h, 0, j, 0)),
            ],
            out_specs=pl.BlockSpec((None, tile_r, C),                  # out tile, hop squeezed
                                   lambda h, j: (h, j, 0)),
        ),
        compiler_params=pltpu.CompilerParams(
            dimension_semantics=("parallel", "parallel"),
            # ~16 MiB double-buffered working set fits with headroom; 32 MiB is
            # the default scoped budget on v6e/v7x and raises v5e's 16 MiB.
            vmem_limit_bytes=32 * 1024 * 1024,
        ),
    )(w_scaled, x_view)
    return out.reshape(H, N, F)


if __name__ == "__main__":
    def reference(x, w):
        # Pure-JAX reference of the PyTorch forward (stacked over hops).
        return jnp.mean(x * w[:, :, None, None], axis=1)

    key = jax.random.PRNGKey(0)

    # (prop_steps H, num_subgraphs S, num_nodes N, features F)
    cases = [
        (3, 4, 16, 128),   # clean lane-aligned case (main path, C = 128)
        (2, 3, 20, 96),    # L = 1920 -> (R, C) = (15, 128): non-multiple-of-8 rows
        (2, 2, 5, 10),     # L = 50 (not % 128) -> fallback (N, F) view
    ]
    for H, S, N, F in cases:
        key, kx, kw = jax.random.split(key, 3)
        # feat_list_list[i][k]  <->  x[i, k]  (each an (N, F) feature matrix)
        x = jax.random.normal(kx, (H, S, N, F), dtype=jnp.float32)
        # Deterministic xavier_uniform-style init for each (1, S) weight:
        # fan_in = S, fan_out = 1 -> bound = sqrt(6 / (S + 1))
        bound = (6.0 / (S + 1)) ** 0.5
        w = jax.random.uniform(kw, (H, S), dtype=jnp.float32,
                               minval=-bound, maxval=bound)

        out = jax.block_until_ready(one_dim_conv_weight_shared(x, w))
        ref = reference(x, w)
        assert out.shape == (H, N, F)
        assert jnp.allclose(out, ref, atol=1e-5, rtol=1e-5), (H, S, N, F)
        for i in range(H):   # per-hop check mirrors the module's list output
            assert jnp.allclose(out[i], ref[i], atol=1e-5, rtol=1e-5)

    print("KERNEL_OK")
</pallas_src>

<mosaic_0001>
module attributes {stable_mosaic.version = 11 : i64} {
  func.func @_weighted_mean_kernel(%arg0: i32, %arg1: i32, %arg2: memref<12xf32, #tpu.memory_space<smem>>, %arg3: memref<1x4x16x128xf32, #tpu.memory_space<vmem>>, %arg4: memref<1x16x128xf32, #tpu.memory_space<vmem>>) attributes {dimension_semantics = [#tpu.dimension_semantics<parallel>, #tpu.dimension_semantics<parallel>], iteration_bounds = array<i64: 3, 1>, scalar_prefetch = 0 : i64, scratch_operands = 0 : i64, tpu.core_type = #tpu.core_type<tc>, window_params = [{transform_indices = @transform_0, window_bounds = array<i64: 12>}, {transform_indices = @transform_1, window_bounds = array<i64: 1, 4, 16, 128>}, {transform_indices = @transform_2, window_bounds = array<i64: 1, 16, 128>}]} {
    %c0 = arith.constant 0 : index
    %c0_0 = arith.constant 0 : index
    %c0_1 = arith.constant 0 : index
    %c0_2 = arith.constant 0 : index
    %0 = vector.load %arg3[%c0, %c0_0, %c0_1, %c0_2] : memref<1x4x16x128xf32, #tpu.memory_space<vmem>>, vector<1x1x16x128xf32>
    %1 = vector.shape_cast %0 : vector<1x1x16x128xf32> to vector<16x128xf32>
    %c4_i32 = arith.constant 4 : i32
    %2 = arith.muli %arg0, %c4_i32 : i32
    %3 = arith.index_cast %2 : i32 to index
    %4 = memref.load %arg2[%3] : memref<12xf32, #tpu.memory_space<smem>>
    %5 = vector.broadcast %4 : f32 to vector<16x128xf32>
    %6 = arith.mulf %1, %5 : vector<16x128xf32>
    %c0_3 = arith.constant 0 : index
    %c1 = arith.constant 1 : index
    %c0_4 = arith.constant 0 : index
    %c0_5 = arith.constant 0 : index
    %7 = vector.load %arg3[%c0_3, %c1, %c0_4, %c0_5] : memref<1x4x16x128xf32, #tpu.memory_space<vmem>>, vector<1x1x16x128xf32>
    %8 = vector.shape_cast %7 : vector<1x1x16x128xf32> to vector<16x128xf32>
    %c4_i32_6 = arith.constant 4 : i32
    %9 = arith.muli %arg0, %c4_i32_6 : i32
    %c1_i32 = arith.constant 1 : i32
    %10 = arith.addi %9, %c1_i32 : i32
    %11 = arith.index_cast %10 : i32 to index
    %12 = memref.load %arg2[%11] : memref<12xf32, #tpu.memory_space<smem>>
    %13 = vector.broadcast %12 : f32 to vector<16x128xf32>
    %14 = arith.mulf %8, %13 : vector<16x128xf32>
    %15 = arith.addf %6, %14 : vector<16x128xf32>
    %c0_7 = arith.constant 0 : index
    %c2 = arith.constant 2 : index
    %c0_8 = arith.constant 0 : index
    %c0_9 = arith.constant 0 : index
    %16 = vector.load %arg3[%c0_7, %c2, %c0_8, %c0_9] : memref<1x4x16x128xf32, #tpu.memory_space<vmem>>, vector<1x1x16x128xf32>
    %17 = vector.shape_cast %16 : vector<1x1x16x128xf32> to vector<16x128xf32>
    %c4_i32_10 = arith.constant 4 : i32
    %18 = arith.muli %arg0, %c4_i32_10 : i32
    %c2_i32 = arith.constant 2 : i32
    %19 = arith.addi %18, %c2_i32 : i32
    %20 = arith.index_cast %19 : i32 to index
    %21 = memref.load %arg2[%20] : memref<12xf32, #tpu.memory_space<smem>>
    %22 = vector.broadcast %21 : f32 to vector<16x128xf32>
    %23 = arith.mulf %17, %22 : vector<16x128xf32>
    %24 = arith.addf %15, %23 : vector<16x128xf32>
    %c0_11 = arith.constant 0 : index
    %c3 = arith.constant 3 : index
    %c0_12 = arith.constant 0 : index
    %c0_13 = arith.constant 0 : index
    %25 = vector.load %arg3[%c0_11, %c3, %c0_12, %c0_13] : memref<1x4x16x128xf32, #tpu.memory_space<vmem>>, vector<1x1x16x128xf32>
    %26 = vector.shape_cast %25 : vector<1x1x16x128xf32> to vector<16x128xf32>
    %c4_i32_14 = arith.constant 4 : i32
    %27 = arith.muli %arg0, %c4_i32_14 : i32
    %c3_i32 = arith.constant 3 : i32
    %28 = arith.addi %27, %c3_i32 : i32
    %29 = arith.index_cast %28 : i32 to index
    %30 = memref.load %arg2[%29] : memref<12xf32, #tpu.memory_space<smem>>
    %31 = vector.broadcast %30 : f32 to vector<16x128xf32>
    %32 = arith.mulf %26, %31 : vector<16x128xf32>
    %33 = arith.addf %24, %32 : vector<16x128xf32>
    %c0_15 = arith.constant 0 : index
    %c0_16 = arith.constant 0 : index
    %c0_17 = arith.constant 0 : index
    %34 = vector.load %arg4[%c0_15, %c0_16, %c0_17] : memref<1x16x128xf32, #tpu.memory_space<vmem>>, vector<1x16x128xf32>
    %35 = vector.shape_cast %34 : vector<1x16x128xf32> to vector<16x128xf32>
    %36 = vector.shape_cast %33 : vector<16x128xf32> to vector<1x16x128xf32>
    tpu.vector_store %arg4[%c0_15, %c0_16, %c0_17], %36 {strides = array<i32>} : memref<1x16x128xf32, #tpu.memory_space<vmem>>, vector<1x16x128xf32>,
    return
  }
  func.func @transform_0(%arg0: i32, %arg1: i32) -> i32 {
    %c0_i32 = arith.constant 0 : i32
    %c0_i32_0 = arith.constant 0 : i32
    return %c0_i32 : i32
  }
  func.func @transform_1(%arg0: i32, %arg1: i32) -> (i32, i32, i32, i32) {
    %c0_i32 = arith.constant 0 : i32
    %c0_i32_0 = arith.constant 0 : i32
    %c0_i32_1 = arith.constant 0 : i32
    return %arg0, %c0_i32, %arg1, %c0_i32_0 : i32, i32, i32, i32
  }
  func.func @transform_2(%arg0: i32, %arg1: i32) -> (i32, i32, i32) {
    %c0_i32 = arith.constant 0 : i32
    %c0_i32_0 = arith.constant 0 : i32
    return %arg0, %arg1, %c0_i32 : i32, i32, i32
  }
}

</mosaic_0001>

<bundles_post_ra>
// kernel: tpu_custom_call.1
= control target key start
LH: loop header
LB: loop body
LE: loop exit
PB: predicated region body
PF: predicated region fallthrough
CT: control target
= control target key end

     0   :  { %s761_s0 = inlined_call_operand.hbm [shape: f32[12], index: 0, kind: input, shape index: {}]   ;;  %s762_s1 = inlined_call_operand.hbm [shape: f32[3,4,16,128], index: 1, kind: input, shape index: {}]   ;;  %s763_s2 = inlined_call_operand.hbm [shape: f32[3,16,128], index: 2, kind: output, shape index: {}]  }
   0x1   :  { %764 = sst [smem:[#allocation11_spill]] %s761_s0 }
   0x2   :  { %7 = vsyncpa [#allocation5], 0 }
   0x3   :  { %8 = vsyncpa [#allocation3], 0 }
   0x4   :  { %10 = vsyncpa [#allocation3 + $0x1], 0 }
   0x5   :  { %11 = vsyncpa [#allocation4], 0 }
   0x6   :  { %13 = vsyncpa [#allocation4 + $0x1], 0  ;;  %s598_s9 = smov 0   ;;  %s600_s10 = smov 0  }
   0x7   :  { %s602_s11 = smov 0   ;;  %s604_s12 = smov 0  }
   0x8   :  { %s606_s13 = smov 0   ;;  %s608_s14 = smov 0  }
   0x9 LB: > { %s348_s15 = sadd.s32 4294967295, %s574_s14   ;;  %s349_s16 = sadd.s32 4294967294, %s574_s14   ;;  %s574_s14 = sphi %s608_s14, %s19_s14   ;;  %s570_s13 = sphi %s606_s13, %s777_s13   ;;  %s566_s12 = sphi %s604_s12, %s776_s12   ;;  %s562_s11 = sphi %s602_s11, %s775_s11   ;;  %s558_s10 = sphi %s600_s10, %s774_s10   ;;  %s554_s9 = sphi %s598_s9, %s773_s9  }
   0xa   : > { %s61_s17 = sadd.s32 1, %s562_s11  ;;  %p68_p0 = scmp.ne.s32.totalorder %s562_s11, %s558_s10 }
   0xb   : > { %p69_p1 = scmp.eq.s32.totalorder %s574_s14, 0  ;;  %p74_p2 = scmp.ne.s32.totalorder %s558_s10, %s554_s9 }
   0xc   : > { %p636_p3 = scmp.eq.s32.totalorder %s348_s15, 0  ;;  %p100_p4 = scmp.eq.s32.totalorder %s348_s15, 2 }
   0xd   : > { %p70_p5 = por %p69_p1, %p68_p0  ;;  %p106_p6 = scmp.eq.s32.totalorder %s349_s16, 2 }
   0xe   : > { %p642_p7 = por %p636_p3, %p74_p2  ;;  %p646_p8 = por %p100_p4, %p68_p0 }
   0xf   : > { %p650_p9 = por %p106_p6, %p74_p2  ;;  %p350_p10 = scmp.ge.s32.totalorder %s574_s14, 1 }
  0x10   : > { %p113_p11 = scmp.lt.s32.totalorder %s574_s14, 4  ;;  %p395_p13 = scmp.lt.s32.totalorder %s574_s14, 3 }
  0x11   : > { %s768_s21 = scalar_select %p650_p9, 1, 0 }
  0x12   : > { %p656_p12 = pnand %p350_p10, %p113_p11  ;;  %s135_s23 = sand.u32 1, %s562_s11  }
  0x13   : > { %p664_p1 = pnand %p395_p13, %p70_p5  ;;  %s31_s25 = sadd.s32 1, %s570_s13 }
  0x14   : > { %p382_p0 = pneg %p656_p12  ;;  %s353_s26 = sshll.u32 %s135_s23, 6 }
  0x15   : > { %p33_p4 = scmp.ge.s32.totalorder %s31_s25, 3  ;;  %s576_s27 = smov [#allocation2]  }
  0x16   : > { %p383_p2 = pnand %p382_p0, %p636_p3  ;;  %s771_s0 = sld [smem:[#allocation11_spill]] }
  0x17   : > { %s779_s25 = smov (%p33_p4, %s31_s25), 0  ;;  %s372_s30 = sshll.u32 %s570_s13, 10 }
  0x18   : > { %s56_s3 = ssub.s32 %s570_s13, %s779_s25  ;;  %s147_s6 = scalar_lea.hbm %s762_s1, %s372_s30 }
  0x19   : > { %p59_p5 = scmp.eq.s32.totalorder %s56_s3, 0  ;;  %s139_s7 = scalar_lea.vmem [#allocation6], %s353_s26 }
  0x1a   : > { %s148_s8 = sshll.u32 %s139_s7, 4  ;;  %s136_s16 = scalar_lea.sflag [#allocation3], %s135_s23  ;;  %s149_s8 = int_to_ptr.vmem [resolvable:$true] %s148_s8 }
  0x1b   : > { %s685_s15 = scalar_select %p59_p5, %s562_s11, %s61_s17  }
  0x1c   : > { %385 = dma.hbm_to_smem (!%p383_p2), %s771_s0, 16, %s576_s27, [#allocation5]  }
  0x1d   : > { %p464_p6 = pneg %p664_p1  ;;  %s475_s27 = scalar_lea.vmem %s149_s8, 1024 }
  0x1e   : > { %p476_p10 = scmp.ne.s32.totalorder %s149_s8, %s475_s27  ;;  %s577_s28 = smov [#allocation6]  }
  0x1f   : > { %s480_s29 = sshll.u32 %s577_s28, 4  ;;  %s481_s29 = int_to_ptr.vmem [resolvable:$false] %s480_s29 }
  0x20   : > { %p478_p11 = pnand %p476_p10, %p464_p6  ;;  %s482_s0 = scalar_lea.vmem %s481_s29, 2048 }
  0x21   : > { %p483_p0 = scmp.lt.s32.totalorder %s149_s8, %s481_s29  ;;  %p484_p2 = scmp.lt.s32.totalorder %s482_s0, %s475_s27 }
  0x22   : > { %p479_p13 = pneg %p478_p11 }
  0x23   : > { %p485_p4 = por %p484_p2, %p483_p0 }
  0x25   : > { %p486_p9 = pnand %p485_p4, %p479_p13 }
  0x27   : > { %489 = shalt.err (!%p486_p9)
}
  0x28   : > { %s578_s26 = smov 128   ;;  %s579_s17 = smov 8  }
  0x29   : > { %389 = dma.hbm_to_vmem [thread:$0]  (!%p664_p1), %s147_s6, 1024, %s149_s8, %s136_s16, %s578_s26, %s578_s26, %s579_s17  }
  0x2a   : > { %160 = sbr.rel (%p656_p12) target bundleno = 85 (0x55), region = 28 }
  0x2f   : > { %541 = dma.done.wait (%p636_p3), [#allocation5], 16  }
  0x30   : > { %543 = vsyncadd (%p636_p3), [#allocation5], 4294967280  ;;  %s698_s0 = sand.u32 1, %s558_s10  }
  0x31   : > { %s358_s23 = sshll.u32 %s698_s0, 6  ;;  %s167_s30 = scalar_lea.sflag [#allocation3], %s698_s0 }
  0x32   : > { %s170_s3 = scalar_lea.vmem [#allocation6], %s358_s23 }
  0x33   : > { %545 = dma.done.wait (%p642_p7), %s167_s30, 1024  }
  0x34   : > { %547 = vsyncadd (%p642_p7), %s167_s30, 4294966272 }
  0x35   : > { %175 = sfence }
  0x36   : > { %s360_s22 = sshll.u32 %s566_s12, 2  ;;  %s359_s8 = sshll.u32 %s698_s0, 4  ;;  %v194_v0 = vld [vmem:[%s170_s3] sm:$0xff]  ;;  %v195_v1 = vld [vmem:[%s170_s3 + $0x8] sm:$0xff]  ;;  %v361_v3 = vld [vmem:[%s170_s3 + $0x10] sm:$0xff] }
  0x37   : > { %s197_s18 = sld [smem:[#allocation2 + %s360_s22]]  ;;  %s204_s24 = sadd.s32 1, %s360_s22  ;;  %v362_v4 = vld [vmem:[%s170_s3 + $0x18] sm:$0xff]  ;;  %v363_v6 = vld [vmem:[%s170_s3 + $0x20] sm:$0xff]  ;;  %v364_v8 = vld [vmem:[%s170_s3 + $0x28] sm:$0xff] }
  0x38   : > { %s214_s4 = sadd.s32 2, %s360_s22  ;;  %s205_s5 = sld [smem:[#allocation2 + %s204_s24]]  ;;  %v365_v10 = vld [vmem:[%s170_s3 + $0x30] sm:$0xff]  ;;  %v366_v11 = vld [vmem:[%s170_s3 + $0x38] sm:$0xff] }
  0x39   : > { %s224_s6 = sadd.s32 3, %s360_s22  ;;  %s215_s7 = sld [smem:[#allocation2 + %s214_s4]] }
  0x3a   : > { %s225_s16 = sld [smem:[#allocation2 + %s224_s6]]  ;;  %s191_s19 = scalar_lea.vmem [#allocation7], %s359_s8 }
  0x3b   : > { %s249_s27 = sshll.u32 %s191_s19, 4  ;;  %s373_s28 = sshll.u32 %s566_s12, 8  ;;  %s709_s27 = int_to_ptr.vmem [resolvable:$true] %s249_s27 }
  0x3c   : > { %s714_s17 = scalar_lea.hbm %s763_s2, %s373_s28  ;;  %s234_s23 = scalar_lea.sflag [#allocation4], %s698_s0 }
  0x3d   : > { %v198_v2 = vstv %s197_s18  ;;  %s490_s30 = scalar_lea.vmem %s709_s27, 256  ;;  %s580_s12 = smov [#allocation7]  }
  0x3e   : > { %v199_v5 = vmul.f32 %v198_v2, %v194_v0  ;;  %v200_v7 = vmul.f32 %v198_v2, %v195_v1  ;;  %v206_v9 = vstv %s205_s5  ;;  %p491_p3 = scmp.ne.s32.totalorder %s709_s27, %s490_s30  ;;  %s494_s3 = sshll.u32 %s580_s12, 4  ;;  %s495_s3 = int_to_ptr.vmem [resolvable:$false] %s494_s3 }
  0x3f   : > { %v207_v12 = vmul.f32 %v361_v3, %v206_v9  ;;  %v216_v13 = vstv %s215_s7  ;;  %v208_v14 = vmul.f32 %v362_v4, %v206_v9  ;;  %s496_s22 = scalar_lea.vmem %s495_s3, 512  ;;  %p497_p12 = scmp.lt.s32.totalorder %s709_s27, %s495_s3 }
  0x40   : > { %v217_v15 = vmul.f32 %v363_v6, %v216_v13  ;;  %v226_v16 = vstv %s225_s16  ;;  %v218_v17 = vmul.f32 %v364_v8, %v216_v13  ;;  %p492_p7 = pnand %p491_p3, %p646_p8  ;;  %p498_p1 = scmp.lt.s32.totalorder %s496_s22, %s490_s30 }
  0x41   : > { %v209_v18 = vadd.f32 %v207_v12, %v199_v5  ;;  %v227_v19 = vmul.f32 %v365_v10, %v226_v16  ;;  %v210_v20 = vadd.f32 %v208_v14, %v200_v7  ;;  %v228_v21 = vmul.f32 %v366_v11, %v226_v16 }
  0x42   : > { %p493_p9 = pneg %p492_p7  ;;  %p499_p5 = por %p498_p1, %p497_p12 }
  0x43   : > { %v219_v22 = vadd.f32 %v217_v15, %v209_v18  ;;  %v220_v23 = vadd.f32 %v218_v17, %v210_v20 }
  0x44   : > { %p500_p6 = pnand %p499_p5, %p493_p9 }
  0x45   : > { %v229_v24 = vadd.f32 %v227_v19, %v219_v22  ;;  %v230_v25 = vadd.f32 %v228_v21, %v220_v23 }
  0x47   : > { %231 = vst [vmem:[%s191_s19] sm:$0xff] %v229_v24  ;;  %232 = vst [vmem:[%s191_s19 + $0x8] sm:$0xff] %v230_v25 }
  0x48   : > { %503 = shalt.err (!%p500_p6)
}
  0x49   : > { %s504_s18 = scalar_lea.hbm %s714_s17, 256  ;;  %s508_s5 = scalar_lea.hbm %s763_s2, 768 }
  0x4a   : > { %p505_p10 = scmp.ne.s32.totalorder %s714_s17, %s504_s18  ;;  %p509_p0 = scmp.lt.s32.totalorder %s714_s17, %s763_s2 }
  0x4b   : > { %p510_p2 = scmp.lt.s32.totalorder %s508_s5, %s504_s18 }
  0x4c   : > { %p506_p11 = pnand %p505_p10, %p646_p8 }
  0x4d   : > { %p511_p4 = por %p510_p2, %p509_p0 }
  0x4e   : > { %p507_p13 = pneg %p506_p11 }
  0x50   : > { %p512_p3 = pnand %p511_p4, %p507_p13 }
  0x52   : > { %515 = shalt.err (!%p512_p3)
}
  0x53   : > { %s581_s8 = smov 128   ;;  %s582_s16 = smov 8  }
  0x54   : > { %380 = dma.vmem_to_hbm [thread:$0]  (%p646_p8), %s709_s27, 256, %s714_s17, %s234_s23, %s581_s8, %s581_s8, %s582_s16  }
  0x55 PF: > { %p397_p7 = scmp.ge.s32.totalorder %s574_s14, 2  ;;  %s264_s19 = sand.u32 1, %s554_s9  }
  0x56   : > { %p772_p9 = scmp.ne.s32.totalorder %s768_s21, 0  ;;  %s265_s28 = scalar_lea.sflag [#allocation4], %s264_s19 }
  0x58   : > { %p391_p12 = pnand %p397_p7, %p772_p9 }
  0x5a   : > { %p392_p1 = pneg %p391_p12 }
  0x5c   : > { %549 = dma.done.wait (%p392_p1), %s265_s28, 256  }
  0x5d   : > { %551 = vsyncadd (%p392_p1), %s265_s28, 4294967040  ;;  %s19_s14 = sadd.s32 1, %s574_s14   ;;  %s773_s9 = smov %s558_s10 }
  0x5e   : > { %p16_p5 = scmp.ge.s32.totalorder %s19_s14, 5   ;;  %s774_s10 = smov %s562_s11 }
  0x5f   : > { %s775_s11 = smov %s685_s15  ;;  %s776_s12 = smov %s570_s13 }
  0x60   : > { %s777_s13 = smov %s779_s25  ;;  %18 = sbr.rel (!%p16_p5) target bundleno = 9 (0x9), region = 81 }
  0x65   :  { %270 = vsyncpa [#allocation3], 1 }
  0x66   :  { %272 = vsyncpa [#allocation3 + $0x1], 1 }
  0x67   :  { %273 = vsyncpa [#allocation4], 1 }
  0x68   :  { %275 = vsyncpa [#allocation4 + $0x1], 1 }
  0x69   :  { %276 = vsyncpa [#allocation5], 1 }
  0x6a   :  { %278 = vsyncpa [#allocation5 + $0x1], 1 }

</bundles_post_ra>
